<compile_context>
chip_gen: v7x
topology: tpu7x:2x2x1
jax: 0.10.0
libtpu: 0.0.40
codegen_flags: <defaults>
</compile_context>

<pallas_src>
import functools

import jax
import jax.numpy as jnp
from jax.experimental import pallas as pl
from jax.experimental.pallas import tpu as pltpu


def _round_up(x, m):
    return ((x + m - 1) // m) * m


def _pow_modulator(one_minus_p, gamma):
    """(1 - p)^gamma, specialized for small integer gamma (trace-time choice)."""
    g = float(gamma)
    if g == 0.0:
        return jnp.ones_like(one_minus_p)
    if g.is_integer() and 1 <= int(g) <= 4:
        r = one_minus_p
        for _ in range(int(g) - 1):
            r = r * one_minus_p
        return r
    return jnp.power(one_minus_p, g)


def _row_losses(pred, tgt, alpha_t, gamma):
    """Per-row focal loss in log space.

    pred (TN, C) any float, tgt (TN, 1) i32, alpha_t (TN, 1) f32 -> (TN, 1) f32.
    """
    x = pred.astype(jnp.float32)
    m = jnp.max(x, axis=-1, keepdims=True)                       # (TN, 1)
    xs = x - m
    denom = jnp.sum(jnp.exp(xs), axis=-1, keepdims=True)         # >= 1, never 0
    col = jax.lax.broadcasted_iota(jnp.int32, x.shape, 1)
    onehot = (col == tgt)                                        # one_hot(target)
    x_t = jnp.sum(jnp.where(onehot, xs, 0.0), axis=-1, keepdims=True)
    # Clamp so round-off can't push log_p above 0 (keeps 1 - p_t >= 0, so a
    # fractional gamma never hits pow(negative, frac) = NaN).
    log_p = jnp.minimum(x_t - jnp.log(denom), 0.0)               # log softmax[target]
    p_t = jnp.exp(log_p)
    return -alpha_t.astype(jnp.float32) * _pow_modulator(1.0 - p_t, gamma) * log_p


def _focal_partial_kernel(pred_ref, tgt_ref, alpha_t_ref, out_ref,
                          *, gamma, n_rows, row_tile):
    """One per-tile partial sum, written into a lane-aligned (1, 128) chunk."""
    loss = _row_losses(pred_ref[...], tgt_ref[...], alpha_t_ref[...], gamma)
    # Mask rows past the true batch size (edge block); MUST be a select, not a
    # multiply, because padding rows may hold NaN/Inf from stale VMEM.
    row = (pl.program_id(0) * row_tile
           + jax.lax.broadcasted_iota(jnp.int32, loss.shape, 0))
    loss = jnp.where(row < n_rows, loss, 0.0)
    s = jnp.sum(loss)                                            # per-tile partial
    lane = jax.lax.broadcasted_iota(jnp.int32, (1, 128), 1)
    out_ref[...] = jnp.where(lane == 0, s, 0.0)                  # partial in lane 0


def _focal_none_kernel(pred_ref, tgt_ref, alpha_t_ref, out_ref, *, gamma):
    # Rows past N in the edge block are clipped by the output writeback DMA,
    # so no row-validity mask is needed here.
    out_ref[...] = _row_losses(pred_ref[...], tgt_ref[...], alpha_t_ref[...], gamma)


def _vmem_limit_bytes():
    """3/4 of physical VMEM, capped at 64 MiB (safe on v5e/v6e/v7x)."""
    try:
        cap = int(pltpu.get_tpu_info().vmem_capacity_bytes)
    except Exception:
        cap = 64 * 1024 * 1024        # conservative fallback (v7x-sized)
    return min(3 * cap // 4, 64 * 1024 * 1024)


def _choose_row_tile(n_rows, n_classes, itemsize, vmem_block_budget,
                     max_rows=None):
    """Largest row tile whose VMEM footprint (I/O blocks + f32 temporaries)
    fits the budget."""
    lanes = _round_up(n_classes, 128)                 # lane padding in VMEM
    per_row = (2 * lanes * itemsize                   # double-buffered predict block
               + 3 * lanes * 4                        # in-kernel f32 temps (upcast/exp/select)
               + 4 * 128 * 4)                         # target + alpha_t blocks (x2 buffers)
    tn = vmem_block_budget // per_row
    cap = 4096 if max_rows is None else max_rows
    tn = max(16, min(tn, cap))
    if tn >= n_rows:
        return n_rows                 # single block; block dim == array dim is legal
    return max(16, (tn // 16) * 16)   # multiple of 16 sublanes (f32 and bf16 tiles)


def multi_ce_focal_loss(predict, target, alpha=None, gamma=2.0,
                        reduction="mean", row_tile=None):
    """JAX/Pallas equivalent of MultiCEFocalLoss.forward(predict, target).

    `predict` may be f32 or bf16 (bf16 halves HBM traffic; compute is f32).
    """
    N, C = predict.shape
    target = target.astype(jnp.int32)
    if alpha is None:
        alpha_t = jnp.ones((N, 1), jnp.float32)       # module default: ones
    else:
        alpha_vec = jnp.asarray(alpha, jnp.float32).reshape(-1)
        alpha_t = alpha_vec[target].reshape(N, 1)     # hoisted alpha[target] gather
    tgt2d = target.reshape(N, 1)

    itemsize = jnp.dtype(predict.dtype).itemsize
    vmem_limit = _vmem_limit_bytes()
    tn = _choose_row_tile(N, C, itemsize,
                          vmem_block_budget=vmem_limit // 3, max_rows=row_tile)
    num_tiles = pl.cdiv(N, tn)
    grid = (num_tiles,)

    in_specs = [
        pl.BlockSpec((tn, C), lambda i: (i, 0)),
        pl.BlockSpec((tn, 1), lambda i: (i, 0)),
        pl.BlockSpec((tn, 1), lambda i: (i, 0)),
    ]
    flops = 8 * N * C
    transcendentals = N * (C + 2)
    in_bytes = N * C * itemsize + N * 4 + N * 4

    compiler_params = pltpu.CompilerParams(
        dimension_semantics=("parallel",),    # no serial accumulator -> v7x dual-TC
        vmem_limit_bytes=vmem_limit)

    if reduction in ("mean", "sum"):
        partials = pl.pallas_call(
            functools.partial(_focal_partial_kernel, gamma=float(gamma),
                              n_rows=N, row_tile=tn),
            out_shape=jax.ShapeDtypeStruct((1, 128 * num_tiles), jnp.float32),
            grid=grid,
            in_specs=in_specs,
            out_specs=pl.BlockSpec((1, 128), lambda i: (0, i)),
            compiler_params=compiler_params,
            cost_estimate=pl.CostEstimate(
                flops=flops, transcendentals=transcendentals,
                bytes_accessed=in_bytes + 128 * num_tiles * 4),
        )(predict, tgt2d, alpha_t)
        total = jnp.sum(partials)             # stage-2 reduce (tiny, in XLA)
        if reduction == "mean":
            return total / jnp.float32(N)
        return total
    elif reduction == "none":
        # Per-row loss, shape (N, 1) like PyTorch's .view(-1, 1).
        return pl.pallas_call(
            functools.partial(_focal_none_kernel, gamma=float(gamma)),
            out_shape=jax.ShapeDtypeStruct((N, 1), jnp.float32),
            grid=grid,
            in_specs=in_specs,
            out_specs=pl.BlockSpec((tn, 1), lambda i: (i, 0)),
            compiler_params=compiler_params,
            cost_estimate=pl.CostEstimate(
                flops=flops, transcendentals=transcendentals,
                bytes_accessed=in_bytes + N * 4),
        )(predict, tgt2d, alpha_t)
    else:
        raise ValueError(f"unknown reduction: {reduction!r}")


def _reference(pred, tgt, gamma=2.0, reduction="mean", alpha=None):
    """Pure-JAX reference matching the PyTorch module."""
    Cn = pred.shape[-1]
    a = (jnp.ones((Cn,), jnp.float32) if alpha is None
         else jnp.asarray(alpha, jnp.float32).reshape(Cn))
    logp = jax.nn.log_softmax(pred.astype(jnp.float32), axis=-1)
    lp_t = jnp.take_along_axis(logp, tgt[:, None], axis=-1)[:, 0]
    p_t = jnp.exp(lp_t)
    loss = -a[tgt] * jnp.power(1.0 - p_t, gamma) * lp_t
    if reduction == "mean":
        return jnp.mean(loss)
    if reduction == "sum":
        return jnp.sum(loss)
    return loss.reshape(-1, 1)


if __name__ == "__main__":
    key = jax.random.PRNGKey(0)
    N, C = 16, 8                      # batch of 16 predictions over 8 classes
    kp, kt = jax.random.split(key)
    predict = jax.random.normal(kp, (N, C), dtype=jnp.float32)
    target = jax.random.randint(kt, (N,), 0, C, dtype=jnp.int32)

    # mean (module default)
    out_mean = jax.block_until_ready(
        multi_ce_focal_loss(predict, target, gamma=2.0, reduction="mean"))
    ref_mean = _reference(predict, target, 2.0, "mean")
    assert jnp.allclose(out_mean, ref_mean, rtol=1e-5, atol=1e-6), (out_mean, ref_mean)

    # sum
    out_sum = jax.block_until_ready(
        multi_ce_focal_loss(predict, target, gamma=2.0, reduction="sum"))
    assert jnp.allclose(out_sum, _reference(predict, target, 2.0, "sum"),
                        rtol=1e-5, atol=1e-6)

    # none -> (N, 1)
    out_none = jax.block_until_ready(
        multi_ce_focal_loss(predict, target, gamma=2.0, reduction="none"))
    assert out_none.shape == (N, 1)
    assert jnp.allclose(out_none, _reference(predict, target, 2.0, "none"),
                        rtol=1e-5, atol=1e-6)

    # ragged batch (N not a multiple of the row tile) exercises the edge mask
    # and the multi-tile partial-sum path
    N2 = 20
    kp2, kt2 = jax.random.split(jax.random.PRNGKey(1))
    predict2 = jax.random.normal(kp2, (N2, C), dtype=jnp.float32)
    target2 = jax.random.randint(kt2, (N2,), 0, C, dtype=jnp.int32)
    out2 = jax.block_until_ready(
        multi_ce_focal_loss(predict2, target2, reduction="mean", row_tile=16))
    assert jnp.allclose(out2, _reference(predict2, target2), rtol=1e-5, atol=1e-6)

    # per-class alpha weights (exercises the hoisted alpha[target] gather)
    alpha = jnp.arange(1, C + 1, dtype=jnp.float32) / C
    out_a = jax.block_until_ready(
        multi_ce_focal_loss(predict, target, alpha=alpha, reduction="mean"))
    assert jnp.allclose(out_a, _reference(predict, target, 2.0, "mean", alpha=alpha),
                        rtol=1e-5, atol=1e-6)

    # non-integer gamma exercises jnp.power + the log_p clamp (NaN guard)
    out_g = jax.block_until_ready(
        multi_ce_focal_loss(predict, target, gamma=1.5, reduction="mean"))
    assert jnp.isfinite(out_g)
    assert jnp.allclose(out_g, _reference(predict, target, 1.5, "mean"),
                        rtol=1e-4, atol=1e-5)

    # bf16 activations (half the HBM traffic); compute is still f32 in-kernel
    pred_bf16 = predict.astype(jnp.bfloat16)
    out_bf16 = jax.block_until_ready(
        multi_ce_focal_loss(pred_bf16, target, reduction="mean"))
    ref_bf16 = _reference(pred_bf16.astype(jnp.float32), target)
    assert jnp.allclose(out_bf16, ref_bf16, rtol=1e-4, atol=1e-5)

    print("KERNEL_OK")
</pallas_src>

<mosaic_0001>
module attributes {stable_mosaic.version = 11 : i64} {
  func.func @_focal_partial_kernel(%arg0: i32, %arg1: memref<16x8xf32, #tpu.memory_space<vmem>>, %arg2: memref<16x1xi32, #tpu.memory_space<vmem>>, %arg3: memref<16x1xf32, #tpu.memory_space<vmem>>, %arg4: memref<1x128xf32, #tpu.memory_space<vmem>>) attributes {dimension_semantics = [#tpu.dimension_semantics<parallel>], iteration_bounds = array<i64: 1>, scalar_prefetch = 0 : i64, scratch_operands = 0 : i64, tpu.core_type = #tpu.core_type<tc>, window_params = [{transform_indices = @transform_0, window_bounds = array<i64: 16, 8>}, {transform_indices = @transform_1, window_bounds = array<i64: 16, 1>}, {transform_indices = @transform_2, window_bounds = array<i64: 16, 1>}, {transform_indices = @transform_3, window_bounds = array<i64: 1, 128>}]} {
    %c0 = arith.constant 0 : index
    %c0_0 = arith.constant 0 : index
    %0 = vector.load %arg1[%c0, %c0_0] : memref<16x8xf32, #tpu.memory_space<vmem>>, vector<16x8xf32>
    %c0_1 = arith.constant 0 : index
    %c0_2 = arith.constant 0 : index
    %1 = vector.load %arg2[%c0_1, %c0_2] : memref<16x1xi32, #tpu.memory_space<vmem>>, vector<16x1xi32>
    %c0_3 = arith.constant 0 : index
    %c0_4 = arith.constant 0 : index
    %2 = vector.load %arg3[%c0_3, %c0_4] : memref<16x1xf32, #tpu.memory_space<vmem>>, vector<16x1xf32>
    %cst = arith.constant dense<0xFF800000> : vector<16xf32>
    %3 = vector.multi_reduction <maximumf>, %0, %cst [1] : vector<16x8xf32> to vector<16xf32>
    %4 = vector.shape_cast %3 : vector<16xf32> to vector<16x1xf32>
    %5 = vector.broadcast %4 : vector<16x1xf32> to vector<16x8xf32>
    %6 = arith.subf %0, %5 : vector<16x8xf32>
    %7 = math.exp %6 : vector<16x8xf32>
    %cst_5 = arith.constant dense<0.000000e+00> : vector<16xf32>
    %8 = vector.multi_reduction <add>, %7, %cst_5 [1] : vector<16x8xf32> to vector<16xf32>
    %9 = vector.shape_cast %8 : vector<16xf32> to vector<16x1xf32>
    %10 = tpu.iota {dimensions = array<i32: 1>} : vector<16x8xi32>
    %11 = vector.broadcast %1 : vector<16x1xi32> to vector<16x8xi32>
    %12 = arith.cmpi eq, %10, %11 : vector<16x8xi32>
    %cst_6 = arith.constant 0.000000e+00 : f32
    %13 = vector.broadcast %cst_6 : f32 to vector<16x8xf32>
    %14 = arith.select %12, %6, %13 : vector<16x8xi1>, vector<16x8xf32>
    %cst_7 = arith.constant dense<0.000000e+00> : vector<16xf32>
    %15 = vector.multi_reduction <add>, %14, %cst_7 [1] : vector<16x8xf32> to vector<16xf32>
    %16 = vector.shape_cast %15 : vector<16xf32> to vector<16x1xf32>
    %17 = math.log %9 : vector<16x1xf32>
    %18 = arith.subf %16, %17 : vector<16x1xf32>
    %cst_8 = arith.constant 0.000000e+00 : f32
    %19 = vector.broadcast %cst_8 : f32 to vector<16x1xf32>
    %20 = arith.minimumf %18, %19 : vector<16x1xf32>
    %21 = math.exp %20 : vector<16x1xf32>
    %cst_9 = arith.constant 0.000000e+00 : f32
    %22 = vector.broadcast %cst_9 : f32 to vector<16x1xf32>
    %23 = arith.subf %22, %2 : vector<16x1xf32>
    %cst_10 = arith.constant 1.000000e+00 : f32
    %24 = vector.broadcast %cst_10 : f32 to vector<16x1xf32>
    %25 = arith.subf %24, %21 : vector<16x1xf32>
    %26 = arith.mulf %25, %25 : vector<16x1xf32>
    %27 = arith.mulf %23, %26 : vector<16x1xf32>
    %28 = arith.mulf %27, %20 : vector<16x1xf32>
    %c16_i32 = arith.constant 16 : i32
    %29 = arith.muli %arg0, %c16_i32 : i32
    %30 = tpu.iota {dimensions = array<i32: 0>} : vector<16x1xi32>
    %31 = vector.broadcast %29 : i32 to vector<16x1xi32>
    %32 = arith.addi %31, %30 : vector<16x1xi32>
    %c16_i32_11 = arith.constant 16 : i32
    %33 = vector.broadcast %c16_i32_11 : i32 to vector<16x1xi32>
    %34 = arith.cmpi slt, %32, %33 : vector<16x1xi32>
    %cst_12 = arith.constant 0.000000e+00 : f32
    %35 = vector.broadcast %cst_12 : f32 to vector<16x1xf32>
    %36 = arith.select %34, %28, %35 : vector<16x1xi1>, vector<16x1xf32>
    %37 = vector.shape_cast %36 : vector<16x1xf32> to vector<1x16x1xf32>
    %cst_13 = arith.constant dense<0.000000e+00> : vector<1xf32>
    %38 = vector.multi_reduction <add>, %37, %cst_13 [1, 2] : vector<1x16x1xf32> to vector<1xf32>
    %39 = vector.shape_cast %38 : vector<1xf32> to vector<1x1x1xf32>
    %40 = vector.extract %39[0, 0, 0] : f32 from vector<1x1x1xf32>
    %41 = tpu.iota {dimensions = array<i32: 1>} : vector<1x128xi32>
    %c0_i32 = arith.constant 0 : i32
    %42 = vector.broadcast %c0_i32 : i32 to vector<1x128xi32>
    %43 = arith.cmpi eq, %41, %42 : vector<1x128xi32>
    %cst_14 = arith.constant 0.000000e+00 : f32
    %44 = vector.broadcast %40 : f32 to vector<1x128xf32>
    %45 = vector.broadcast %cst_14 : f32 to vector<1x128xf32>
    %46 = arith.select %43, %44, %45 : vector<1x128xi1>, vector<1x128xf32>
    %c0_15 = arith.constant 0 : index
    %c0_16 = arith.constant 0 : index
    %47 = vector.load %arg4[%c0_15, %c0_16] : memref<1x128xf32, #tpu.memory_space<vmem>>, vector<1x128xf32>
    tpu.vector_store %arg4[%c0_15, %c0_16], %46 {strides = array<i32>} : memref<1x128xf32, #tpu.memory_space<vmem>>, vector<1x128xf32>,
    return
  }
  func.func @transform_0(%arg0: i32) -> (i32, i32) {
    %c0_i32 = arith.constant 0 : i32
    %c0_i32_0 = arith.constant 0 : i32
    return %arg0, %c0_i32 : i32, i32
  }
  func.func @transform_1(%arg0: i32) -> (i32, i32) {
    %c0_i32 = arith.constant 0 : i32
    %c0_i32_0 = arith.constant 0 : i32
    return %arg0, %c0_i32 : i32, i32
  }
  func.func @transform_2(%arg0: i32) -> (i32, i32) {
    %c0_i32 = arith.constant 0 : i32
    %c0_i32_0 = arith.constant 0 : i32
    return %arg0, %c0_i32 : i32, i32
  }
  func.func @transform_3(%arg0: i32) -> (i32, i32) {
    %c0_i32 = arith.constant 0 : i32
    %c0_i32_0 = arith.constant 0 : i32
    return %c0_i32, %arg0 : i32, i32
  }
}

</mosaic_0001>

<bundles_post_ra>
// kernel: tpu_custom_call.1
= control target key start
LH: loop header
LB: loop body
LE: loop exit
PB: predicated region body
PF: predicated region fallthrough
CT: control target
= control target key end

     0   :  { %vm21_vm0 = vcmask 64512   ;;  %v164_v4 = vmov 0   ;;  %s227_s0 = inlined_call_operand.vmem [shape: f32[16,8], index: 0, kind: input, shape index: {}]   ;;  %s228_s1 = inlined_call_operand.vmem [shape: s32[16,1], index: 1, kind: input, shape index: {}]   ;;  %s229_s2 = inlined_call_operand.vmem [shape: f32[16,1], index: 2, kind: input, shape index: {}]   ;;  %s230_s3 = inlined_call_operand.hbm [shape: f32[1,128], index: 3, kind: output, shape index: {}]  }
   0x1   :  { %v15_v0 = vld [vmem:[%s227_s0] sm:$0xff]  ;;  %v16_v1 = vld [vmem:[%s227_s0 + $0x8] sm:$0xff]  ;;  %126 = vset.pattern.permute.xlu1 %v164_v4  ;;  %127 = vset.pattern.permute.xlu0 %v164_v4 }
   0x2   :  { %v17_v2 = vld [vmem:[%s228_s1] sm:$0xff]  ;;  %v22_v3 = vsel %vm21_vm0, %v15_v0, -inf }
   0x3   :  { %8 = vsyncpa [#allocation3], 0  ;;  %23 = vmax.xlane.f32.xlu0 %v22_v3  ;;  %43 = vperm.xlu1 %126, %v17_v2   ;;  %v25_v5 = vsel %vm21_vm0, %v16_v1, -inf  ;;  %v18_v6 = vld [vmem:[%s228_s1 + $0x8] sm:$0xff]  ;;  %v40_v12 = vlaneseq  ;;  %v19_v39 = vld [vmem:[%s229_s2] sm:$0xff]  ;;  %vm91_vm3 = vcmask 7168  }
   0x4   :  { %v70_v41 = vsub.f32 0.0, %v19_v39  ;;  %v20_v43 = vld [vmem:[%s229_s2 + $0x8] sm:$0xff]  ;;  %s165_s2 = smov [#allocation2]  }
   0x5   :  { %v200_v15 = vand.u32 127, %v40_v12  ;;  %v71_v47 = vsub.f32 0.0, %v20_v43  ;;  %s114_s22 = sshll.u32 %s165_s2, 4  ;;  %s115_s22 = int_to_ptr.vmem [resolvable:$true] %s114_s22 }
   0x6   :  { %s140_s24 = scalar_lea.vmem %s115_s22, 16  ;;  %s144_s25 = scalar_lea.vmem %s115_s22, 32 }
   0x7   :  { %26 = vmax.xlane.f32.xlu0 %v25_v5  ;;  %46 = vperm.xlu1 %126, %v18_v6   ;;  %vm104_vm4 = vcmp.eq.s32.totalorder %v200_v15, 0  ;;  %p141_p0 = scmp.ne.s32.totalorder %s115_s22, %s140_s24  ;;  %p145_p1 = scmp.lt.s32.totalorder %s115_s22, %s115_s22 }
   0x8   :  { %p146_p2 = scmp.lt.s32.totalorder %s144_s25, %s140_s24 }
   0xa   :  { %p147_p3 = por %p146_p2, %p145_p1 }
   0xc   :  { %p148_p4 = pnand %p147_p3, %p141_p0 }
  0x82   :  { %v44_v14 = vpop.permute.xlu1 %43 }
  0x83   :  { %vm48_vm1 = vcmp.eq.s32.totalorder %v200_v15, %v44_v14 }
  0x86   :  { %v47_v17 = vpop.permute.xlu1 %46 }
  0x87   :  { %vm49_vm2 = vcmp.eq.s32.totalorder %v200_v15, %v47_v17 }
  0x90   :  { %v24_v7 = vpop.xlane.xlu0 %23 }
  0x91   :  { %v28_v8 = vsub.f32 %v15_v0, %v24_v7 }
  0x93   :  { %v30_v9 = vmul.f32 1.442695, %v28_v8  ;;  %v50_v19 = vsel %vm48_vm1, %v28_v8, 0.0 }
  0x94   :  { %v27_v10 = vpop.xlane.xlu0 %26  ;;  %v52_v21 = vsel %vm21_vm0, %v50_v19, 0.0 }
  0x95   :  { %128 = vpow2.f32 %v30_v9  ;;  %v29_v11 = vsub.f32 %v16_v1, %v27_v10 }
  0x97   :  { %v32_v13 = vmul.f32 1.442695, %v29_v11  ;;  %v51_v23 = vsel %vm49_vm2, %v29_v11, 0.0 }
  0x98   :  { %v55_v24 = vsel %vm21_vm0, %v51_v23, 0.0 }
  0x99   :  { %130 = vpow2.f32 %v32_v13 }
  0x9f   :  { %v129_v16 = vpop.eup %128 }
  0xa0   :  { %v34_v18 = vsel %vm21_vm0, %v129_v16, 0.0 }
  0xa1   :  { %35 = vadd.xlane.f32.xlu0 %v34_v18 }
  0xa3   :  { %v131_v20 = vpop.eup %130 }
  0xa4   :  { %v37_v22 = vsel %vm21_vm0, %v131_v20, 0.0 }
  0xa5   :  { %53 = vadd.xlane.f32.xlu0 %v52_v21  ;;  %38 = vadd.xlane.f32.xlu1 %v37_v22 }
  0xa9   :  { %56 = vadd.xlane.f32.xlu0 %v55_v24 }
 0x12e   :  { %v36_v25 = vpop.xlane.xlu0 %35 }
 0x12f   :  { %132 = vlog2.f32 %v36_v25 }
 0x132   :  { %v39_v26 = vpop.xlane.xlu1 %38  ;;  %v54_v28 = vpop.xlane.xlu0 %53 }
 0x133   :  { %134 = vlog2.f32 %v39_v26 }
 0x136   :  { %v57_v34 = vpop.xlane.xlu0 %56 }
 0x139   :  { %v133_v27 = vpop.eup %132 }
 0x13a   :  { %v59_v29 = vmul.f32 0.6931472, %v133_v27 }
 0x13c   :  { %v62_v30 = vsub.f32 %v54_v28, %v59_v29 }
 0x13d   :  { %v135_v31 = vpop.eup %134 }
 0x13e   :  { %v64_v32 = vmin.f32 %v62_v30, 0.0  ;;  %v61_v33 = vmul.f32 0.6931472, %v135_v31 }
 0x140   :  { %v66_v35 = vmul.f32 1.442695, %v64_v32  ;;  %v63_v36 = vsub.f32 %v57_v34, %v61_v33 }
 0x142   :  { %136 = vpow2.f32 %v66_v35  ;;  %v65_v37 = vmin.f32 %v63_v36, 0.0 }
 0x144   :  { %v68_v38 = vmul.f32 1.442695, %v65_v37 }
 0x146   :  { %138 = vpow2.f32 %v68_v38 }
 0x14c   :  { %v137_v40 = vpop.eup %136 }
 0x14d   :  { %v72_v42 = vsub.f32 1.0, %v137_v40 }
 0x14f   :  { %v74_v44 = vmul.f32 %v72_v42, %v72_v42 }
 0x150   :  { %v139_v45 = vpop.eup %138 }
 0x151   :  { %v76_v46 = vmul.f32 %v74_v44, %v70_v41  ;;  %v73_v48 = vsub.f32 1.0, %v139_v45 }
 0x153   :  { %v75_v49 = vmul.f32 %v73_v48, %v73_v48  ;;  %v78_v50 = vmul.f32 %v76_v46, %v64_v32 }
 0x155   :  { %v77_v51 = vmul.f32 %v75_v49, %v71_v47  ;;  %v92_v53 = vsel %vm91_vm3, %v78_v50, 0.0 }
 0x157   :  { %v79_v52 = vmul.f32 %v77_v51, %v65_v37 }
 0x159   :  { %v93_v54 = vsel %vm91_vm3, %v79_v52, 0.0 }
 0x15a   :  { %v94_v55 = vadd.f32 %v93_v54, %v92_v53 }
 0x15c   :  { %95 = vadd.xlane.f32.xlu0 %v94_v55 }
 0x1e9   :  { %v96_v56 = vpop.xlane.xlu0 %95 }
 0x1ea   :  { %v97_v57 = vrot.slane %v96_v56, 4 }
 0x1ec   :  { %v98_v58 = vadd.f32 %v97_v57, %v96_v56 }
 0x1ee   :  { %v99_v59 = vrot.slane %v98_v58, 2 }
 0x1f0   :  { %v100_v60 = vadd.f32 %v99_v59, %v98_v58 }
 0x1f2   :  { %v101_v61 = vrot.slane %v100_v60, 1 }
 0x1f4   :  { %v102_v62 = vadd.f32 %v101_v61, %v100_v60 }
 0x1f6   :  { %122 = vpush %v102_v62 }
 0x227   :  { %s123_s23 = spop %122 }
 0x228   :  { %v105_v63 = vstv %s123_s23 }
 0x229   :  { %v106_v0 = vsel %vm104_vm4, %v105_v63, 0.0 }
 0x22a   :  { %107 = vst [vmem:[#allocation2] sm:$0x1] %v106_v0 }
 0x22b   :  { %151 = shalt.err (!%p148_p4)
}
 0x22c   :  { %s152_s28 = scalar_lea.hbm %s230_s3, 16 }
 0x22d   :  { %p153_p5 = scmp.ne.s32.totalorder %s230_s3, %s152_s28  ;;  %p156_p6 = scmp.lt.u32.totalorder %s152_s28, %s230_s3 }
 0x22f   :  { %p158_p7 = pnand %p156_p6, %p153_p5 }
 0x231   :  { %161 = shalt.err (!%p158_p7)
}
 0x232   :  { %117 = dma.vmem_to_hbm [thread:$0]  %s115_s22, 16, %s230_s3, [#allocation3]  }
 0x233   :  { %162 = dma.done.wait [#allocation3], 16  }
 0x234   :  { %163 = vsyncadd [#allocation3], 4294967280 }
 0x235   :  { %121 = vsyncpa [#allocation3], 1 }

</bundles_post_ra>
